<compile_context>
chip_gen: v7x
topology: tpu7x:2x2x1
jax: 0.10.0
libtpu: 0.0.40
codegen_flags: <defaults>
</compile_context>

<pallas_src>
import functools

import jax
import jax.numpy as jnp
from jax.experimental import pallas as pl
from jax.experimental.pallas import tpu as pltpu

KH = KW = 3  # 3x3 conv, padding=1


def _round_up(x, m):
    return ((x + m - 1) // m) * m


def _res_block_kernel(HP, x_ref, b1_ref, c1_ref, b2_ref, c2_ref, o_ref,
                      xp1_ref, xp2_ref):
    """Bn images per grid step; both conv+BN+ReLU layers fused.

    Layout of the padded scratch buffers (flat over images):
      rows [0, 8)                      : zero prefix (top halo of image 0)
      rows [8 + b*HP, 8 + b*HP + H)    : image b (8-aligned, lanes [0, W*C))
      rows [8 + b*HP + H, 8 + (b+1)*HP): zero pad (bottom halo of b / top halo
                                         of b+1), HP - H >= 1 aligned rows
      last 8 rows                      : slack for the ky=2 shifted read
      lanes [W*C, (W+2)*C)             : zero halo width-columns (tail lanes)

    The conv is 3 MXU matmuls (one per ky) with M = Bn*HP rows; rows belonging
    to halo/pad positions are over-computed and dropped.
    """
    Bn, H, WCo = o_ref.shape          # W*Cout lanes (128 in the demo)
    WCi = x_ref.shape[2]              # W*Cin_p lanes
    R1, PCi = xp1_ref.shape           # (W+2)*Cin_p
    R2, PCo = xp2_ref.shape           # (W+2)*Cout
    M = Bn * HP

    f32 = jnp.float32
    bf16 = jnp.bfloat16

    # ---------------- layer 1: conv3x3(pad=1) + folded BN + ReLU --------------
    # Halo-only zeroing (interior rows are fully overwritten below).
    xp1_ref[pl.ds(0, R1), pl.ds(WCi, PCi - WCi)] = jnp.zeros((R1, PCi - WCi), f32)
    xp1_ref[pl.ds(0, 8), pl.ds(0, WCi)] = jnp.zeros((8, WCi), f32)
    for b in range(Bn):
        xp1_ref[pl.ds(8 + b * HP, H), pl.ds(0, WCi)] = x_ref[b]
        xp1_ref[pl.ds(8 + b * HP + H, HP - H), pl.ds(0, WCi)] = (
            jnp.zeros((HP - H, WCi), f32))

    acc = jnp.zeros((M, WCo), f32)
    for ky in range(KH):              # 3 MXU matmuls, K=(W+2)*Cin_p, bf16 inputs
        lhs = xp1_ref[pl.ds(7 + ky, M), :].astype(bf16)
        acc = acc + jnp.dot(lhs, b1_ref[ky], preferred_element_type=f32)

    # ---------------- layer 2: conv3x3(pad=1) + folded BN + ReLU --------------
    xp2_ref[pl.ds(0, R2), pl.ds(WCo, PCo - WCo)] = jnp.zeros((R2, PCo - WCo), f32)
    xp2_ref[pl.ds(0, 8), pl.ds(0, WCo)] = jnp.zeros((8, WCo), f32)
    bias1 = c1_ref[...]
    for b in range(Bn):
        y1_b = jnp.maximum(acc[b * HP:b * HP + H, :] + bias1, 0.0)
        xp2_ref[pl.ds(8 + b * HP, H), pl.ds(0, WCo)] = y1_b      # stays in VMEM
        xp2_ref[pl.ds(8 + b * HP + H, HP - H), pl.ds(0, WCo)] = (
            jnp.zeros((HP - H, WCo), f32))

    acc2 = jnp.zeros((M, WCo), f32)
    for ky in range(KH):              # K=(W+2)*Cout, bf16 inputs
        lhs = xp2_ref[pl.ds(7 + ky, M), :].astype(bf16)
        acc2 = acc2 + jnp.dot(lhs, b2_ref[ky], preferred_element_type=f32)

    bias2 = c2_ref[...]
    for b in range(Bn):               # lane-dense (128-wide) writeback
        o_ref[b] = jnp.maximum(acc2[b * HP:b * HP + H, :] + bias2,
                               0.0).astype(o_ref.dtype)


def _fold_bn_and_band(w, b, gamma, beta, mean, var, W_sp, eps):
    """Fold inference BN into conv weights/bias and build the banded matrix.

    Returns:
      band:     (KH, (W_sp+2)*Cin, W_sp*Cout) bf16, with
                band[ky, wp*Cin+ci, w*Cout+co] = (w*scale)[ky, wp-w, ci, co]
                for 0 <= wp-w < KW, else 0; the padded-width axis is reordered
                so the two halo columns sit at the tail lanes.
      bias_row: (1, W_sp*Cout) f32 folded bias tiled over W.
    """
    kh, kw, cin, cout = w.shape
    scale = gamma / jnp.sqrt(var + eps)                       # (Cout,)
    w_s = (w * scale).astype(jnp.float32)                     # BN scale -> weights
    bias = ((b - mean) * scale + beta).astype(jnp.float32)    # BN shift -> bias

    # O[kx, wp, w] = 1 iff wp == w + kx  (wp indexes the padded width 0..W+1)
    eye = jnp.eye(W_sp, dtype=jnp.float32)
    O = jnp.zeros((kw, W_sp + 2, W_sp), jnp.float32)
    for kx in range(kw):
        O = O.at[kx, kx:kx + W_sp, :].set(eye)

    # band5[ky, wp, ci, w, co] = w_s[ky, wp - w, ci, co] inside the band
    band5 = jnp.einsum("kpw,ykio->ypiwo", O, w_s)
    # Real columns (wp=1..W) first, the two zero halo columns last -> the kernel
    # stores the activation slab at lane offset 0 (aligned, unmasked stores).
    band5 = jnp.concatenate(
        [band5[:, 1:W_sp + 1], band5[:, 0:1], band5[:, W_sp + 1:]], axis=1)
    band = band5.reshape(kh, (W_sp + 2) * cin, W_sp * cout).astype(jnp.bfloat16)

    bias_row = jnp.tile(bias, W_sp).reshape(1, W_sp * cout)
    return band, bias_row


def residual_block_forward(x_nchw, params, *, eps=1e-5):
    """Mirrors ResidualBlock.forward (drop=0, BN in inference mode).

    x_nchw: (N, Cin, H, W) -- PyTorch layout. Internally packed NHWC->(N,H,W*C).
    """
    N, Cin, H, W = x_nchw.shape
    Cout = params["w1"].shape[-1]

    Cin_p = _round_up(Cin, 8)          # lane-dense layer-1 activation slab
    HP = _round_up(H + 1, 8)           # rows per image slab in scratch

    # Images per grid step: maximize matmul M = Bn*HP, capped at 256 so a single
    # (M, 128) f32 accumulator stays <= 32 vregs; Bn must divide N.
    Bn = 1
    for bn in range(1, N + 1):
        if N % bn == 0 and bn * HP <= 256:
            Bn = bn

    x = jnp.transpose(x_nchw, (0, 2, 3, 1))                    # NHWC
    if Cin_p != Cin:
        x = jnp.pad(x, ((0, 0), (0, 0), (0, 0), (0, Cin_p - Cin)))
    x = x.reshape(N, H, W * Cin_p)

    w1 = params["w1"]
    if Cin_p != Cin:
        w1 = jnp.pad(w1, ((0, 0), (0, 0), (0, Cin_p - Cin), (0, 0)))

    b1, c1 = _fold_bn_and_band(w1, params["b1"], params["g1"],
                               params["be1"], params["m1"], params["v1"], W, eps)
    b2, c2 = _fold_bn_and_band(params["w2"], params["b2"], params["g2"],
                               params["be2"], params["m2"], params["v2"], W, eps)

    kernel = functools.partial(_res_block_kernel, HP)

    out_flat = pl.pallas_call(
        kernel,
        out_shape=jax.ShapeDtypeStruct((N, H, W * Cout), jnp.float32),
        grid_spec=pltpu.PrefetchScalarGridSpec(
            num_scalar_prefetch=0,
            grid=(N // Bn,),
            in_specs=[
                pl.BlockSpec((Bn, H, W * Cin_p), lambda n: (n, 0, 0)),
                pl.BlockSpec(b1.shape, lambda n: (0, 0, 0)),
                pl.BlockSpec(c1.shape, lambda n: (0, 0)),
                pl.BlockSpec(b2.shape, lambda n: (0, 0, 0)),
                pl.BlockSpec(c2.shape, lambda n: (0, 0)),
            ],
            out_specs=pl.BlockSpec((Bn, H, W * Cout), lambda n: (n, 0, 0)),
            scratch_shapes=[
                pltpu.VMEM((Bn * HP + 16, (W + 2) * Cin_p), jnp.float32),
                pltpu.VMEM((Bn * HP + 16, (W + 2) * Cout), jnp.float32),
            ],
        ),
        compiler_params=pltpu.CompilerParams(
            dimension_semantics=("parallel",)),
    )(x, b1, c1, b2, c2)

    out = out_flat.reshape(N, H, W, Cout)
    return jnp.transpose(out, (0, 3, 1, 2))  # back to NCHW


def _reference_forward(x_nchw, params, eps=1e-5):
    """Pure-JAX reference (lax.conv, f32) for a sanity check."""
    def conv(x, w, b):
        w_oihw = jnp.transpose(w, (3, 2, 0, 1))
        y = jax.lax.conv_general_dilated(
            x, w_oihw, window_strides=(1, 1), padding=((1, 1), (1, 1)),
            dimension_numbers=("NCHW", "OIHW", "NCHW"))
        return y + b.reshape(1, -1, 1, 1)

    def bn_relu(x, g, be, m, v):
        s = g / jnp.sqrt(v + eps)
        y = (x - m.reshape(1, -1, 1, 1)) * s.reshape(1, -1, 1, 1) + be.reshape(1, -1, 1, 1)
        return jnp.maximum(y, 0.0)

    x = bn_relu(conv(x_nchw, params["w1"], params["b1"]),
                params["g1"], params["be1"], params["m1"], params["v1"])
    x = bn_relu(conv(x, params["w2"], params["b2"]),
                params["g2"], params["be2"], params["m2"], params["v2"])
    return x


def make_params(key, cin, cout):
    ks = jax.random.split(key, 12)
    return {
        "w1": 0.1 * jax.random.normal(ks[0], (KH, KW, cin, cout), jnp.float32),
        "b1": 0.1 * jax.random.normal(ks[1], (cout,), jnp.float32),
        "g1": 1.0 + 0.1 * jax.random.normal(ks[2], (cout,), jnp.float32),
        "be1": 0.1 * jax.random.normal(ks[3], (cout,), jnp.float32),
        "m1": 0.05 * jax.random.normal(ks[4], (cout,), jnp.float32),
        "v1": 1.0 + 0.1 * jnp.abs(jax.random.normal(ks[5], (cout,), jnp.float32)),
        "w2": 0.1 * jax.random.normal(ks[6], (KH, KW, cout, cout), jnp.float32),
        "b2": 0.1 * jax.random.normal(ks[7], (cout,), jnp.float32),
        "g2": 1.0 + 0.1 * jax.random.normal(ks[8], (cout,), jnp.float32),
        "be2": 0.1 * jax.random.normal(ks[9], (cout,), jnp.float32),
        "m2": 0.05 * jax.random.normal(ks[10], (cout,), jnp.float32),
        "v2": 1.0 + 0.1 * jnp.abs(jax.random.normal(ks[11], (cout,), jnp.float32)),
    }


if __name__ == "__main__":
    key = jax.random.PRNGKey(0)
    k_x, k_p = jax.random.split(key)

    N, Cin, Cout, H, W = 2, 4, 8, 16, 16
    x = jax.random.normal(k_x, (N, Cin, H, W), jnp.float32)  # PyTorch NCHW input
    params = make_params(k_p, Cin, Cout)

    fwd = jax.jit(functools.partial(residual_block_forward, params=params))
    out = jax.block_until_ready(fwd(x))

    ref = jax.block_until_ready(_reference_forward(x, params))
    assert out.shape == (N, Cout, H, W), out.shape
    # Tolerance loosened vs the f32 path: MXU inputs are bf16 (f32 accumulation).
    assert jnp.allclose(out, ref, atol=3e-2, rtol=3e-2), float(jnp.max(jnp.abs(out - ref)))

    print("KERNEL_OK")
</pallas_src>

<mosaic_0001>
module attributes {stable_mosaic.version = 11 : i64} {
  func.func @_res_block_kernel(%arg0: i32, %arg1: memref<2x16x128xf32, #tpu.memory_space<vmem>>, %arg2: memref<3x144x128xbf16, #tpu.memory_space<vmem>>, %arg3: memref<1x128xf32, #tpu.memory_space<vmem>>, %arg4: memref<3x144x128xbf16, #tpu.memory_space<vmem>>, %arg5: memref<1x128xf32, #tpu.memory_space<vmem>>, %arg6: memref<2x16x128xf32, #tpu.memory_space<vmem>>, %arg7: memref<64x144xf32, #tpu.memory_space<vmem>>, %arg8: memref<64x144xf32, #tpu.memory_space<vmem>>) attributes {dimension_semantics = [#tpu.dimension_semantics<parallel>], iteration_bounds = array<i64: 1>, scalar_prefetch = 0 : i64, scratch_operands = 2 : i64, tpu.core_type = #tpu.core_type<tc>, window_params = [{transform_indices = @transform_0, window_bounds = array<i64: 2, 16, 128>}, {pipeline_mode = #tpu.pipeline_mode<synchronous>, transform_indices = @transform_1, window_bounds = array<i64: 3, 144, 128>}, {pipeline_mode = #tpu.pipeline_mode<synchronous>, transform_indices = @transform_2, window_bounds = array<i64: 1, 128>}, {pipeline_mode = #tpu.pipeline_mode<synchronous>, transform_indices = @transform_3, window_bounds = array<i64: 3, 144, 128>}, {pipeline_mode = #tpu.pipeline_mode<synchronous>, transform_indices = @transform_4, window_bounds = array<i64: 1, 128>}, {transform_indices = @transform_5, window_bounds = array<i64: 2, 16, 128>}]} {
    %cst = arith.constant 0.000000e+00 : f32
    %0 = vector.broadcast %cst : f32 to vector<64x16xf32>
    %c0 = arith.constant 0 : index
    %c128 = arith.constant 128 : index
    %1 = vector.load %arg7[%c0, %c128] : memref<64x144xf32, #tpu.memory_space<vmem>>, vector<64x16xf32>
    tpu.vector_store %arg7[%c0, %c128], %0 {strides = array<i32>} : memref<64x144xf32, #tpu.memory_space<vmem>>, vector<64x16xf32>,
    %cst_0 = arith.constant 0.000000e+00 : f32
    %2 = vector.broadcast %cst_0 : f32 to vector<8x128xf32>
    %c0_1 = arith.constant 0 : index
    %c0_2 = arith.constant 0 : index
    %3 = vector.load %arg7[%c0_1, %c0_2] : memref<64x144xf32, #tpu.memory_space<vmem>>, vector<8x128xf32>
    tpu.vector_store %arg7[%c0_1, %c0_2], %2 {strides = array<i32>} : memref<64x144xf32, #tpu.memory_space<vmem>>, vector<8x128xf32>,
    %c0_3 = arith.constant 0 : index
    %c0_4 = arith.constant 0 : index
    %c0_5 = arith.constant 0 : index
    %4 = vector.load %arg1[%c0_3, %c0_4, %c0_5] : memref<2x16x128xf32, #tpu.memory_space<vmem>>, vector<1x16x128xf32>
    %5 = vector.shape_cast %4 : vector<1x16x128xf32> to vector<16x128xf32>
    %c8 = arith.constant 8 : index
    %c0_6 = arith.constant 0 : index
    %6 = vector.load %arg7[%c8, %c0_6] : memref<64x144xf32, #tpu.memory_space<vmem>>, vector<16x128xf32>
    tpu.vector_store %arg7[%c8, %c0_6], %5 {strides = array<i32>} : memref<64x144xf32, #tpu.memory_space<vmem>>, vector<16x128xf32>,
    %cst_7 = arith.constant 0.000000e+00 : f32
    %7 = vector.broadcast %cst_7 : f32 to vector<8x128xf32>
    %c24 = arith.constant 24 : index
    %c0_8 = arith.constant 0 : index
    %8 = vector.load %arg7[%c24, %c0_8] : memref<64x144xf32, #tpu.memory_space<vmem>>, vector<8x128xf32>
    tpu.vector_store %arg7[%c24, %c0_8], %7 {strides = array<i32>} : memref<64x144xf32, #tpu.memory_space<vmem>>, vector<8x128xf32>,
    %c1 = arith.constant 1 : index
    %c0_9 = arith.constant 0 : index
    %c0_10 = arith.constant 0 : index
    %9 = vector.load %arg1[%c1, %c0_9, %c0_10] : memref<2x16x128xf32, #tpu.memory_space<vmem>>, vector<1x16x128xf32>
    %10 = vector.shape_cast %9 : vector<1x16x128xf32> to vector<16x128xf32>
    %c32 = arith.constant 32 : index
    %c0_11 = arith.constant 0 : index
    %11 = vector.load %arg7[%c32, %c0_11] : memref<64x144xf32, #tpu.memory_space<vmem>>, vector<16x128xf32>
    tpu.vector_store %arg7[%c32, %c0_11], %10 {strides = array<i32>} : memref<64x144xf32, #tpu.memory_space<vmem>>, vector<16x128xf32>,
    %cst_12 = arith.constant 0.000000e+00 : f32
    %12 = vector.broadcast %cst_12 : f32 to vector<8x128xf32>
    %c48 = arith.constant 48 : index
    %c0_13 = arith.constant 0 : index
    %13 = vector.load %arg7[%c48, %c0_13] : memref<64x144xf32, #tpu.memory_space<vmem>>, vector<8x128xf32>
    tpu.vector_store %arg7[%c48, %c0_13], %12 {strides = array<i32>} : memref<64x144xf32, #tpu.memory_space<vmem>>, vector<8x128xf32>,
    %cst_14 = arith.constant 0.000000e+00 : f32
    %14 = vector.broadcast %cst_14 : f32 to vector<48x128xf32>
    %c7 = arith.constant 7 : index
    %c0_15 = arith.constant 0 : index
    %15 = vector.load %arg7[%c7, %c0_15] : memref<64x144xf32, #tpu.memory_space<vmem>>, vector<48x144xf32>
    %16 = arith.truncf %15 : vector<48x144xf32> to vector<48x144xbf16>
    %c0_16 = arith.constant 0 : index
    %c0_17 = arith.constant 0 : index
    %c0_18 = arith.constant 0 : index
    %17 = vector.load %arg2[%c0_16, %c0_17, %c0_18] : memref<3x144x128xbf16, #tpu.memory_space<vmem>>, vector<1x144x128xbf16>
    %18 = vector.shape_cast %17 : vector<1x144x128xbf16> to vector<144x128xbf16>
    %cst_19 = arith.constant dense<0.000000e+00> : vector<48x128xf32>
    %19 = tpu.matmul %16, %18, %cst_19 {dimension_numbers = #tpu.dot_dimension_numbers<[1], [0], [0], [1], [0, 0, 1, 1], [], []>} : vector<48x144xbf16>, vector<144x128xbf16>, vector<48x128xf32> -> vector<48x128xf32>
    %20 = arith.addf %14, %19 : vector<48x128xf32>
    %c8_20 = arith.constant 8 : index
    %c0_21 = arith.constant 0 : index
    %21 = vector.load %arg7[%c8_20, %c0_21] : memref<64x144xf32, #tpu.memory_space<vmem>>, vector<48x144xf32>
    %22 = arith.truncf %21 : vector<48x144xf32> to vector<48x144xbf16>
    %c1_22 = arith.constant 1 : index
    %c0_23 = arith.constant 0 : index
    %c0_24 = arith.constant 0 : index
    %23 = vector.load %arg2[%c1_22, %c0_23, %c0_24] : memref<3x144x128xbf16, #tpu.memory_space<vmem>>, vector<1x144x128xbf16>
    %24 = vector.shape_cast %23 : vector<1x144x128xbf16> to vector<144x128xbf16>
    %cst_25 = arith.constant dense<0.000000e+00> : vector<48x128xf32>
    %25 = tpu.matmul %22, %24, %cst_25 {dimension_numbers = #tpu.dot_dimension_numbers<[1], [0], [0], [1], [0, 0, 1, 1], [], []>} : vector<48x144xbf16>, vector<144x128xbf16>, vector<48x128xf32> -> vector<48x128xf32>
    %26 = arith.addf %20, %25 : vector<48x128xf32>
    %c9 = arith.constant 9 : index
    %c0_26 = arith.constant 0 : index
    %27 = vector.load %arg7[%c9, %c0_26] : memref<64x144xf32, #tpu.memory_space<vmem>>, vector<48x144xf32>
    %28 = arith.truncf %27 : vector<48x144xf32> to vector<48x144xbf16>
    %c2 = arith.constant 2 : index
    %c0_27 = arith.constant 0 : index
    %c0_28 = arith.constant 0 : index
    %29 = vector.load %arg2[%c2, %c0_27, %c0_28] : memref<3x144x128xbf16, #tpu.memory_space<vmem>>, vector<1x144x128xbf16>
    %30 = vector.shape_cast %29 : vector<1x144x128xbf16> to vector<144x128xbf16>
    %cst_29 = arith.constant dense<0.000000e+00> : vector<48x128xf32>
    %31 = tpu.matmul %28, %30, %cst_29 {dimension_numbers = #tpu.dot_dimension_numbers<[1], [0], [0], [1], [0, 0, 1, 1], [], []>} : vector<48x144xbf16>, vector<144x128xbf16>, vector<48x128xf32> -> vector<48x128xf32>
    %32 = arith.addf %26, %31 : vector<48x128xf32>
    %cst_30 = arith.constant 0.000000e+00 : f32
    %33 = vector.broadcast %cst_30 : f32 to vector<64x16xf32>
    %c0_31 = arith.constant 0 : index
    %c128_32 = arith.constant 128 : index
    %34 = vector.load %arg8[%c0_31, %c128_32] : memref<64x144xf32, #tpu.memory_space<vmem>>, vector<64x16xf32>
    tpu.vector_store %arg8[%c0_31, %c128_32], %33 {strides = array<i32>} : memref<64x144xf32, #tpu.memory_space<vmem>>, vector<64x16xf32>,
    %cst_33 = arith.constant 0.000000e+00 : f32
    %35 = vector.broadcast %cst_33 : f32 to vector<8x128xf32>
    %c0_34 = arith.constant 0 : index
    %c0_35 = arith.constant 0 : index
    %36 = vector.load %arg8[%c0_34, %c0_35] : memref<64x144xf32, #tpu.memory_space<vmem>>, vector<8x128xf32>
    tpu.vector_store %arg8[%c0_34, %c0_35], %35 {strides = array<i32>} : memref<64x144xf32, #tpu.memory_space<vmem>>, vector<8x128xf32>,
    %c0_36 = arith.constant 0 : index
    %c0_37 = arith.constant 0 : index
    %37 = vector.load %arg3[%c0_36, %c0_37] : memref<1x128xf32, #tpu.memory_space<vmem>>, vector<1x128xf32>
    %38 = vector.extract_strided_slice %32 {offsets = [0, 0], sizes = [16, 128], strides = [1, 1]} : vector<48x128xf32> to vector<16x128xf32>
    %39 = vector.broadcast %37 : vector<1x128xf32> to vector<16x128xf32>
    %40 = arith.addf %38, %39 : vector<16x128xf32>
    %cst_38 = arith.constant 0.000000e+00 : f32
    %41 = vector.broadcast %cst_38 : f32 to vector<16x128xf32>
    %42 = arith.maximumf %40, %41 : vector<16x128xf32>
    %c8_39 = arith.constant 8 : index
    %c0_40 = arith.constant 0 : index
    %43 = vector.load %arg8[%c8_39, %c0_40] : memref<64x144xf32, #tpu.memory_space<vmem>>, vector<16x128xf32>
    tpu.vector_store %arg8[%c8_39, %c0_40], %42 {strides = array<i32>} : memref<64x144xf32, #tpu.memory_space<vmem>>, vector<16x128xf32>,
    %cst_41 = arith.constant 0.000000e+00 : f32
    %44 = vector.broadcast %cst_41 : f32 to vector<8x128xf32>
    %c24_42 = arith.constant 24 : index
    %c0_43 = arith.constant 0 : index
    %45 = vector.load %arg8[%c24_42, %c0_43] : memref<64x144xf32, #tpu.memory_space<vmem>>, vector<8x128xf32>
    tpu.vector_store %arg8[%c24_42, %c0_43], %44 {strides = array<i32>} : memref<64x144xf32, #tpu.memory_space<vmem>>, vector<8x128xf32>,
    %46 = vector.extract_strided_slice %32 {offsets = [24, 0], sizes = [16, 128], strides = [1, 1]} : vector<48x128xf32> to vector<16x128xf32>
    %47 = vector.broadcast %37 : vector<1x128xf32> to vector<16x128xf32>
    %48 = arith.addf %46, %47 : vector<16x128xf32>
    %cst_44 = arith.constant 0.000000e+00 : f32
    %49 = vector.broadcast %cst_44 : f32 to vector<16x128xf32>
    %50 = arith.maximumf %48, %49 : vector<16x128xf32>
    %c32_45 = arith.constant 32 : index
    %c0_46 = arith.constant 0 : index
    %51 = vector.load %arg8[%c32_45, %c0_46] : memref<64x144xf32, #tpu.memory_space<vmem>>, vector<16x128xf32>
    tpu.vector_store %arg8[%c32_45, %c0_46], %50 {strides = array<i32>} : memref<64x144xf32, #tpu.memory_space<vmem>>, vector<16x128xf32>,
    %cst_47 = arith.constant 0.000000e+00 : f32
    %52 = vector.broadcast %cst_47 : f32 to vector<8x128xf32>
    %c48_48 = arith.constant 48 : index
    %c0_49 = arith.constant 0 : index
    %53 = vector.load %arg8[%c48_48, %c0_49] : memref<64x144xf32, #tpu.memory_space<vmem>>, vector<8x128xf32>
    tpu.vector_store %arg8[%c48_48, %c0_49], %52 {strides = array<i32>} : memref<64x144xf32, #tpu.memory_space<vmem>>, vector<8x128xf32>,
    %cst_50 = arith.constant 0.000000e+00 : f32
    %54 = vector.broadcast %cst_50 : f32 to vector<48x128xf32>
    %c7_51 = arith.constant 7 : index
    %c0_52 = arith.constant 0 : index
    %55 = vector.load %arg8[%c7_51, %c0_52] : memref<64x144xf32, #tpu.memory_space<vmem>>, vector<48x144xf32>
    %56 = arith.truncf %55 : vector<48x144xf32> to vector<48x144xbf16>
    %c0_53 = arith.constant 0 : index
    %c0_54 = arith.constant 0 : index
    %c0_55 = arith.constant 0 : index
    %57 = vector.load %arg4[%c0_53, %c0_54, %c0_55] : memref<3x144x128xbf16, #tpu.memory_space<vmem>>, vector<1x144x128xbf16>
    %58 = vector.shape_cast %57 : vector<1x144x128xbf16> to vector<144x128xbf16>
    %cst_56 = arith.constant dense<0.000000e+00> : vector<48x128xf32>
    %59 = tpu.matmul %56, %58, %cst_56 {dimension_numbers = #tpu.dot_dimension_numbers<[1], [0], [0], [1], [0, 0, 1, 1], [], []>} : vector<48x144xbf16>, vector<144x128xbf16>, vector<48x128xf32> -> vector<48x128xf32>
    %60 = arith.addf %54, %59 : vector<48x128xf32>
    %c8_57 = arith.constant 8 : index
    %c0_58 = arith.constant 0 : index
    %61 = vector.load %arg8[%c8_57, %c0_58] : memref<64x144xf32, #tpu.memory_space<vmem>>, vector<48x144xf32>
    %62 = arith.truncf %61 : vector<48x144xf32> to vector<48x144xbf16>
    %c1_59 = arith.constant 1 : index
    %c0_60 = arith.constant 0 : index
    %c0_61 = arith.constant 0 : index
    %63 = vector.load %arg4[%c1_59, %c0_60, %c0_61] : memref<3x144x128xbf16, #tpu.memory_space<vmem>>, vector<1x144x128xbf16>
    %64 = vector.shape_cast %63 : vector<1x144x128xbf16> to vector<144x128xbf16>
    %cst_62 = arith.constant dense<0.000000e+00> : vector<48x128xf32>
    %65 = tpu.matmul %62, %64, %cst_62 {dimension_numbers = #tpu.dot_dimension_numbers<[1], [0], [0], [1], [0, 0, 1, 1], [], []>} : vector<48x144xbf16>, vector<144x128xbf16>, vector<48x128xf32> -> vector<48x128xf32>
    %66 = arith.addf %60, %65 : vector<48x128xf32>
    %c9_63 = arith.constant 9 : index
    %c0_64 = arith.constant 0 : index
    %67 = vector.load %arg8[%c9_63, %c0_64] : memref<64x144xf32, #tpu.memory_space<vmem>>, vector<48x144xf32>
    %68 = arith.truncf %67 : vector<48x144xf32> to vector<48x144xbf16>
    %c2_65 = arith.constant 2 : index
    %c0_66 = arith.constant 0 : index
    %c0_67 = arith.constant 0 : index
    %69 = vector.load %arg4[%c2_65, %c0_66, %c0_67] : memref<3x144x128xbf16, #tpu.memory_space<vmem>>, vector<1x144x128xbf16>
    %70 = vector.shape_cast %69 : vector<1x144x128xbf16> to vector<144x128xbf16>
    %cst_68 = arith.constant dense<0.000000e+00> : vector<48x128xf32>
    %71 = tpu.matmul %68, %70, %cst_68 {dimension_numbers = #tpu.dot_dimension_numbers<[1], [0], [0], [1], [0, 0, 1, 1], [], []>} : vector<48x144xbf16>, vector<144x128xbf16>, vector<48x128xf32> -> vector<48x128xf32>
    %72 = arith.addf %66, %71 : vector<48x128xf32>
    %c0_69 = arith.constant 0 : index
    %c0_70 = arith.constant 0 : index
    %73 = vector.load %arg5[%c0_69, %c0_70] : memref<1x128xf32, #tpu.memory_space<vmem>>, vector<1x128xf32>
    %74 = vector.extract_strided_slice %72 {offsets = [0, 0], sizes = [16, 128], strides = [1, 1]} : vector<48x128xf32> to vector<16x128xf32>
    %75 = vector.broadcast %73 : vector<1x128xf32> to vector<16x128xf32>
    %76 = arith.addf %74, %75 : vector<16x128xf32>
    %cst_71 = arith.constant 0.000000e+00 : f32
    %77 = vector.broadcast %cst_71 : f32 to vector<16x128xf32>
    %78 = arith.maximumf %76, %77 : vector<16x128xf32>
    %c0_72 = arith.constant 0 : index
    %c0_73 = arith.constant 0 : index
    %c0_74 = arith.constant 0 : index
    %79 = vector.load %arg6[%c0_72, %c0_73, %c0_74] : memref<2x16x128xf32, #tpu.memory_space<vmem>>, vector<1x16x128xf32>
    %80 = vector.shape_cast %79 : vector<1x16x128xf32> to vector<16x128xf32>
    %81 = vector.shape_cast %78 : vector<16x128xf32> to vector<1x16x128xf32>
    tpu.vector_store %arg6[%c0_72, %c0_73, %c0_74], %81 {strides = array<i32>} : memref<2x16x128xf32, #tpu.memory_space<vmem>>, vector<1x16x128xf32>,
    %82 = vector.extract_strided_slice %72 {offsets = [24, 0], sizes = [16, 128], strides = [1, 1]} : vector<48x128xf32> to vector<16x128xf32>
    %83 = vector.broadcast %73 : vector<1x128xf32> to vector<16x128xf32>
    %84 = arith.addf %82, %83 : vector<16x128xf32>
    %cst_75 = arith.constant 0.000000e+00 : f32
    %85 = vector.broadcast %cst_75 : f32 to vector<16x128xf32>
    %86 = arith.maximumf %84, %85 : vector<16x128xf32>
    %c1_76 = arith.constant 1 : index
    %c0_77 = arith.constant 0 : index
    %c0_78 = arith.constant 0 : index
    %87 = vector.load %arg6[%c1_76, %c0_77, %c0_78] : memref<2x16x128xf32, #tpu.memory_space<vmem>>, vector<1x16x128xf32>
    %88 = vector.shape_cast %87 : vector<1x16x128xf32> to vector<16x128xf32>
    %89 = vector.shape_cast %86 : vector<16x128xf32> to vector<1x16x128xf32>
    tpu.vector_store %arg6[%c1_76, %c0_77, %c0_78], %89 {strides = array<i32>} : memref<2x16x128xf32, #tpu.memory_space<vmem>>, vector<1x16x128xf32>,
    return
  }
  func.func @transform_0(%arg0: i32) -> (i32, i32, i32) {
    %c0_i32 = arith.constant 0 : i32
    %c0_i32_0 = arith.constant 0 : i32
    %c0_i32_1 = arith.constant 0 : i32
    return %arg0, %c0_i32, %c0_i32_0 : i32, i32, i32
  }
  func.func @transform_1(%arg0: i32) -> (i32, i32, i32) {
    %c0_i32 = arith.constant 0 : i32
    %c0_i32_0 = arith.constant 0 : i32
    %c0_i32_1 = arith.constant 0 : i32
    %c0_i32_2 = arith.constant 0 : i32
    return %c0_i32, %c0_i32_0, %c0_i32_1 : i32, i32, i32
  }
  func.func @transform_2(%arg0: i32) -> (i32, i32) {
    %c0_i32 = arith.constant 0 : i32
    %c0_i32_0 = arith.constant 0 : i32
    %c0_i32_1 = arith.constant 0 : i32
    return %c0_i32, %c0_i32_0 : i32, i32
  }
  func.func @transform_3(%arg0: i32) -> (i32, i32, i32) {
    %c0_i32 = arith.constant 0 : i32
    %c0_i32_0 = arith.constant 0 : i32
    %c0_i32_1 = arith.constant 0 : i32
    %c0_i32_2 = arith.constant 0 : i32
    return %c0_i32, %c0_i32_0, %c0_i32_1 : i32, i32, i32
  }
  func.func @transform_4(%arg0: i32) -> (i32, i32) {
    %c0_i32 = arith.constant 0 : i32
    %c0_i32_0 = arith.constant 0 : i32
    %c0_i32_1 = arith.constant 0 : i32
    return %c0_i32, %c0_i32_0 : i32, i32
  }
  func.func @transform_5(%arg0: i32) -> (i32, i32, i32) {
    %c0_i32 = arith.constant 0 : i32
    %c0_i32_0 = arith.constant 0 : i32
    %c0_i32_1 = arith.constant 0 : i32
    return %arg0, %c0_i32, %c0_i32_0 : i32, i32, i32
  }
}

</mosaic_0001>

<bundles_post_ra>
// kernel: tile.10
= control target key start
LH: loop header
LB: loop body
LE: loop exit
PB: predicated region body
PF: predicated region fallthrough
CT: control target
= control target key end

     0   :  { %s28_s0 = inlined_call_operand.vmem [shape: f32[8], index: 0, kind: input, shape index: {}]   ;;  %s29_s1 = inlined_call_operand.vmem [shape: f32[16,8], index: 1, kind: output, shape index: {}]  }
   0x1   :  { %v4_v0 = vld [vmem:[%s28_s0] ss:$0 sm:$0xff] }
   0x2   :  { %5 = vst [vmem:[%s29_s1] sm:$0xff] %v4_v0  ;;  %8 = vst [vmem:[%s29_s1 + $0x8] sm:$0xff] %v4_v0 }

// kernel: tile.11
= control target key start
LH: loop header
LB: loop body
LE: loop exit
PB: predicated region body
PF: predicated region fallthrough
CT: control target
= control target key end

     0   :  { %s131_s10 = smov 120   ;;  %s132_s11 = smov 104   ;;  %vm3_vm0 = vcmask 64512   ;;  %vm9_vm1 = vcmask 1048512   ;;  %vm15_vm2 = vcmask 982912   ;;  %vm21_vm3 = vcmask 917312   ;;  %s207_s0 = inlined_call_operand.vmem [shape: f32[16,8], index: 0, kind: input, shape index: {}]   ;;  %s208_s1 = inlined_call_operand.vmem [shape: f32[1,128], index: 1, kind: output, shape index: {}]  }
   0x1   :  { %v101_v0 = vld [vmem:[%s207_s0 + $0xf] sm:$0x1]   ;;  %v103_v1 = vld [vmem:[%s207_s0 + $0xd] sm:$0x1]   ;;  %v102_v2 = vld [vmem:[%s207_s0 + $0xe] sm:$0x1]  }
   0x2   :  { %7 = vrot.lane.b32.xlu0 %v101_v0, %s131_s10  ;;  %19 = vrot.lane.b32.xlu1 %v103_v1, %s132_s11  ;;  %v104_v3 = vld [vmem:[%s207_s0 + $0xc] sm:$0x1]   ;;  %s133_s16 = smov 112   ;;  %s134_s17 = smov 96   ;;  %v105_v4 = vld [vmem:[%s207_s0 + $0xb] sm:$0x1]  }
   0x3   :  { %v106_v5 = vld [vmem:[%s207_s0 + $0xa] sm:$0x1]   ;;  %v2_v6 = vld [vmem:[%s207_s0] sm:$0x1]   ;;  %s135_s24 = smov 88   ;;  %s136_s25 = smov 80  }
   0x4   :  { %4 = vst.msk [vmem:[#allocation0] sm:$0x1] %vm3_vm0, %v2_v6   ;;  %v107_v7 = vld [vmem:[%s207_s0 + $0x9] sm:$0x1]   ;;  %v108_v8 = vld [vmem:[%s207_s0 + $0x8] sm:$0x1]  }
   0x5   :  { %s137_s30 = smov 72   ;;  %s138_s2 = smov 64   ;;  %v109_v9 = vld [vmem:[%s207_s0 + $0x7] sm:$0x1]   ;;  %v110_v10 = vld [vmem:[%s207_s0 + $0x6] sm:$0x1]  }
   0x6   :  { %13 = vrot.lane.b32.xlu0 %v102_v2, %s133_s16  ;;  %25 = vrot.lane.b32.xlu1 %v104_v3, %s134_s17  ;;  %s139_s7 = smov 56   ;;  %s140_s8 = smov 48   ;;  %v111_v11 = vld [vmem:[%s207_s0 + $0x5] sm:$0x1]   ;;  %v112_v12 = vld [vmem:[%s207_s0 + $0x4] sm:$0x1]  }
   0x7   :  { %s141_s13 = smov 40   ;;  %s142_s14 = smov 32   ;;  %v113_v13 = vld [vmem:[%s207_s0 + $0x3] sm:$0x1]   ;;  %v114_v14 = vld [vmem:[%s207_s0 + $0x2] sm:$0x1]  }
   0x8   :  { %s143_s19 = smov 24   ;;  %s144_s20 = smov 16   ;;  %v115_v15 = vld [vmem:[%s207_s0 + $0x1] sm:$0x1]   ;;  %vm27_vm4 = vcmask 851712   ;;  %vm33_vm5 = vcmask 786112  }
   0x9   :  { %s145_s0 = smov 8   ;;  %vm39_vm6 = vcmask 720512   ;;  %vm45_vm7 = vcmask 654912   ;;  %vm51_vm8 = vcmask 589312   ;;  %vm57_vm9 = vcmask 523712  }
   0xa   :  { %31 = vrot.lane.b32.xlu0 %v105_v4, %s135_s24  ;;  %37 = vrot.lane.b32.xlu1 %v106_v5, %s136_s25  ;;  %vm63_vm10 = vcmask 458112   ;;  %vm69_vm11 = vcmask 392512   ;;  %vm75_vm12 = vcmask 326912   ;;  %vm81_vm13 = vcmask 261312  }
   0xb   :  { %vm87_vm14 = vcmask 195712   ;;  %vm93_vm15 = vcmask 130112  }
   0xe   :  { %43 = vrot.lane.b32.xlu0 %v107_v7, %s137_s30  ;;  %49 = vrot.lane.b32.xlu1 %v108_v8, %s138_s2 }
  0x12   :  { %55 = vrot.lane.b32.xlu0 %v109_v9, %s139_s7  ;;  %61 = vrot.lane.b32.xlu1 %v110_v10, %s140_s8 }
  0x16   :  { %67 = vrot.lane.b32.xlu0 %v111_v11, %s141_s13  ;;  %73 = vrot.lane.b32.xlu1 %v112_v12, %s142_s14 }
  0x1a   :  { %79 = vrot.lane.b32.xlu0 %v113_v13, %s143_s19  ;;  %85 = vrot.lane.b32.xlu1 %v114_v14, %s144_s20 }
  0x1e   :  { %91 = vrot.lane.b32.xlu0 %v115_v15, %s145_s0 }
  0x74   :  { %v8_v16 = vpop.permute.xlu0 %7   ;;  %v20_v17 = vpop.permute.xlu1 %19  }
  0x75   :  { %10 = vst.msk [vmem:[#allocation0] sm:$0x1] %vm9_vm1, %v8_v16  }
  0x78   :  { %v14_v18 = vpop.permute.xlu0 %13   ;;  %v26_v19 = vpop.permute.xlu1 %25  }
  0x79   :  { %16 = vst.msk [vmem:[#allocation0] sm:$0x1] %vm15_vm2, %v14_v18  }
  0x7a   :  { %22 = vst.msk [vmem:[#allocation0] sm:$0x1] %vm21_vm3, %v20_v17  }
  0x7b   :  { %28 = vst.msk [vmem:[#allocation0] sm:$0x1] %vm27_vm4, %v26_v19  }
  0x7c   :  { %v32_v20 = vpop.permute.xlu0 %31   ;;  %v38_v21 = vpop.permute.xlu1 %37  }
  0x7d   :  { %34 = vst.msk [vmem:[#allocation0] sm:$0x1] %vm33_vm5, %v32_v20  }
  0x7e   :  { %40 = vst.msk [vmem:[#allocation0] sm:$0x1] %vm39_vm6, %v38_v21  }
  0x80   :  { %v44_v22 = vpop.permute.xlu0 %43   ;;  %v50_v23 = vpop.permute.xlu1 %49  }
  0x81   :  { %46 = vst.msk [vmem:[#allocation0] sm:$0x1] %vm45_vm7, %v44_v22  }
  0x82   :  { %52 = vst.msk [vmem:[#allocation0] sm:$0x1] %vm51_vm8, %v50_v23  }
  0x84   :  { %v56_v24 = vpop.permute.xlu0 %55   ;;  %v62_v25 = vpop.permute.xlu1 %61  }
  0x85   :  { %58 = vst.msk [vmem:[#allocation0] sm:$0x1] %vm57_vm9, %v56_v24  }
  0x86   :  { %64 = vst.msk [vmem:[#allocation0] sm:$0x1] %vm63_vm10, %v62_v25  }
  0x88   :  { %v68_v26 = vpop.permute.xlu0 %67   ;;  %v74_v27 = vpop.permute.xlu1 %73  }
  0x89   :  { %70 = vst.msk [vmem:[#allocation0] sm:$0x1] %vm69_vm11, %v68_v26  }
  0x8a   :  { %76 = vst.msk [vmem:[#allocation0] sm:$0x1] %vm75_vm12, %v74_v27  }
  0x8c   :  { %v80_v28 = vpop.permute.xlu0 %79   ;;  %v86_v29 = vpop.permute.xlu1 %85  }
  0x8d   :  { %82 = vst.msk [vmem:[#allocation0] sm:$0x1] %vm81_vm13, %v80_v28  }
  0x8e   :  { %88 = vst.msk [vmem:[#allocation0] sm:$0x1] %vm87_vm14, %v86_v29  }
  0x90   :  { %v92_v30 = vpop.permute.xlu0 %91  }
  0x91   :  { %94 = vst.msk [vmem:[#allocation0] sm:$0x1] %vm93_vm15, %v92_v30  }
  0x98   :  { %v98_v31 = vld [vmem:[#allocation0] sm:$0x1] }
  0x99   :  { %100 = vst [vmem:[%s208_s1] sm:$0x1] %v98_v31 }

// kernel: residual_block_forward.1
= control target key start
LH: loop header
LB: loop body
LE: loop exit
PB: predicated region body
PF: predicated region fallthrough
CT: control target
= control target key end

     0   :  { %vm21_vm0 = vcmask 130048   ;;  %v1501_v0 = vmov 0   ;;  %v1502_v2 = vmov 0.0   ;;  %vm227_vm1 = vsmask.f32 4352  ;;  %s1943_s1 = inlined_call_operand.vmem [shape: bf16[3,144,128], index: 1, kind: input, shape index: {}]   ;;  %s1944_s0 = inlined_call_operand.vmem [shape: f32[2,16,128], index: 0, kind: input, shape index: {}]   ;;  %s1945_s3 = inlined_call_operand.vmem [shape: bf16[3,144,128], index: 3, kind: input, shape index: {}]   ;;  %s1946_s2 = inlined_call_operand.vmem [shape: f32[1,128], index: 2, kind: input, shape index: {}]   ;;  %s1947_s4 = inlined_call_operand.vmem [shape: f32[1,128], index: 4, kind: input, shape index: {}]   ;;  %s1948_s5 = inlined_call_operand.vmem [shape: f32[2,16,128], index: 5, kind: output, shape index: {}]  }
   0x1   :  { %172 = vmatprep.subr.bf16.mxu0 %v1501_v0  ;;  %364 = vmatprep.subr.bf16.mxu1 %v1501_v0  ;;  %v1446_v1 = vld [vmem:[%s1943_s1 + $0x48] sm:$0xff]   ;;  %22 = vst.msk [vmem:[#allocation2 + $0x8] sm:$0xff] %vm21_vm0, %v1502_v2  ;;  %23 = vst.msk [vmem:[#allocation2 + $0x18] sm:$0xff] %vm21_vm0, %v1502_v2  ;;  %v1447_v3 = vld [vmem:[%s1943_s1] sm:$0xff]   ;;  %vm460_vm2 = vsmask.f32 7424 }
   0x2   :  { %24 = vst.msk [vmem:[#allocation2 + $0x28] sm:$0xff] %vm21_vm0, %v1502_v2  ;;  %25 = vst.msk [vmem:[#allocation2 + $0x38] sm:$0xff] %vm21_vm0, %v1502_v2  ;;  %173 = vmatpush1.bf16.msra.mxu0 %v1446_v1  ;;  %v1448_v4 = vld [vmem:[%s1943_s1 + $0x50] sm:$0xff]   ;;  %365 = vmatpush1.bf16.msra.mxu1 %v1447_v3  ;;  %v1449_v5 = vld [vmem:[%s1943_s1 + $0x8] sm:$0xff]  }
   0x3   :  { %26 = vst.msk [vmem:[#allocation2 + $0x48] sm:$0xff] %vm21_vm0, %v1502_v2  ;;  %27 = vst.msk [vmem:[#allocation2 + $0x58] sm:$0xff] %vm21_vm0, %v1502_v2  ;;  %174 = vmatprep.subr.bf16.mxu0 %v1501_v0  ;;  %366 = vmatprep.subr.bf16.mxu1 %v1501_v0  ;;  %v1450_v6 = vld [vmem:[%s1943_s1 + $0x58] sm:$0xff]   ;;  %v1451_v7 = vld [vmem:[%s1943_s1 + $0x10] sm:$0xff]  }
   0x4   :  { %28 = vst.msk [vmem:[#allocation2 + $0x68] sm:$0xff] %vm21_vm0, %v1502_v2  ;;  %29 = vst.msk [vmem:[#allocation2 + $0x78] sm:$0xff] %vm21_vm0, %v1502_v2  ;;  %v1452_v8 = vld [vmem:[%s1943_s1 + $0x60] sm:$0xff]   ;;  %v1453_v9 = vld [vmem:[%s1943_s1 + $0x18] sm:$0xff]  }
   0x5   :  { %30 = vst [vmem:[#allocation2] sm:$0xff] %v1502_v2  ;;  %41 = vst [vmem:[#allocation2 + $0x60] sm:$0xff] %v1502_v2  ;;  %v1454_v10 = vld [vmem:[%s1943_s1 + $0x68] sm:$0xff]   ;;  %v1455_v11 = vld [vmem:[%s1943_s1 + $0x20] sm:$0xff]  }
   0x6   :  { %642 = vst.msk [vmem:[#allocation3 + $0x8] sm:$0xff] %vm21_vm0, %v1502_v2  ;;  %643 = vst.msk [vmem:[#allocation3 + $0x18] sm:$0xff] %vm21_vm0, %v1502_v2  ;;  %175 = vmatpush1.bf16.msra.mxu0 %v1448_v4  ;;  %367 = vmatpush1.bf16.msra.mxu1 %v1449_v5  ;;  %v1456_v12 = vld [vmem:[%s1943_s1 + $0x70] sm:$0xff]   ;;  %v1457_v13 = vld [vmem:[%s1943_s1 + $0x28] sm:$0xff]  }
   0x7   :  { %644 = vst.msk [vmem:[#allocation3 + $0x28] sm:$0xff] %vm21_vm0, %v1502_v2  ;;  %645 = vst.msk [vmem:[#allocation3 + $0x38] sm:$0xff] %vm21_vm0, %v1502_v2  ;;  %176 = vmatprep.subr.bf16.mxu0 %v1501_v0  ;;  %368 = vmatprep.subr.bf16.mxu1 %v1501_v0  ;;  %v1633_v24 = vld [vmem:[%s1944_s0] sm:$0xff]  ;;  %v1638_v25 = vld [vmem:[%s1944_s0 + $0x8] sm:$0xff] }
   0x8   :  { %646 = vst.msk [vmem:[#allocation3 + $0x48] sm:$0xff] %vm21_vm0, %v1502_v2  ;;  %647 = vst.msk [vmem:[#allocation3 + $0x58] sm:$0xff] %vm21_vm0, %v1502_v2  ;;  %v43_v14 = vld [vmem:[#allocation2 + $0x8] sm:$0x80]  ;;  %v45_v15 = vld [vmem:[#allocation2 + $0x18] sm:$0xff]  ;;  %v58_v30 = vpack.c.bf16 %v1502_v2, %v1638_v25 }
   0x9   :  { %648 = vst.msk [vmem:[#allocation3 + $0x68] sm:$0xff] %vm21_vm0, %v1502_v2  ;;  %649 = vst.msk [vmem:[#allocation3 + $0x78] sm:$0xff] %vm21_vm0, %v1502_v2  ;;  %v1615_v16 = vld [vmem:[#allocation2 + $0x28] sm:$0xff]  ;;  %v1618_v17 = vld [vmem:[#allocation2 + $0x38] sm:$0xff]  ;;  %v57_v20 = vpack.c.bf16 %v45_v15, %v43_v14 }
   0xa   :  { %650 = vst [vmem:[#allocation3] sm:$0xff] %v1502_v2  ;;  %671 = vst [vmem:[#allocation3 + $0x60] sm:$0xff] %v1502_v2  ;;  %177 = vmatpush1.bf16.msra.mxu0 %v1450_v6  ;;  %369 = vmatpush1.bf16.msra.mxu1 %v1451_v7  ;;  %v1620_v18 = vld [vmem:[#allocation2 + $0x48] sm:$0xff]  ;;  %v1622_v19 = vld [vmem:[#allocation2 + $0x58] sm:$0xff]  ;;  %v85_v21 = vpack.c.bf16 %v1615_v16, %v45_v15  ;;  %v59_v22 = vpack.c.bf16 %v1618_v17, %v1615_v16  ;;  %v237_v43 = vshrl.u32 %v58_v30, 16 }
   0xb   :  { %178 = vmatprep.subr.bf16.mxu0 %v1501_v0  ;;  %370 = vmatprep.subr.bf16.mxu1 %v1501_v0  ;;  %v61_v23 = vpack.c.bf16 %v1622_v19, %v1620_v18  ;;  %v246_v27 = vshrl.u32 %v57_v20, 16  ;;  %v249_v28 = vshll.u32 %v57_v20, 16  ;;  %33 = vst [vmem:[#allocation2 + $0x10] sm:$0xff] %v1633_v24  ;;  %v1458_v31 = vld [vmem:[%s1943_s1 + $0x78] sm:$0xff]   ;;  %v1459_v32 = vld [vmem:[%s1943_s1 + $0x30] sm:$0xff]   ;;  %v1460_v39 = vld [vmem:[%s1943_s1 + $0x80] sm:$0xff]   ;;  %v84_v6 = vpack.c.bf16 %v1638_v25, %v1633_v24 }
   0xc   :  { %v42_v26 = vld [vmem:[#allocation2] sm:$0x80]  ;;  %1323 = vmatprep.mubr.msk.bf16.mxu0 %vm21_vm0, %v85_v21  ;;  %v254_v33 = vshrl.u32 %v59_v22, 16  ;;  %v257_v34 = vshll.u32 %v59_v22, 16  ;;  %v240_v46 = vshll.u32 %v58_v30, 16  ;;  %v1461_v47 = vld [vmem:[%s1943_s1 + $0x38] sm:$0xff]  }
   0xd   :  { %v56_v29 = vpack.c.bf16 %v1633_v24, %v42_v26  ;;  %v248_v35 = vrot.slane %v246_v27, 3  ;;  %v251_v36 = vrot.slane %v249_v28, 4  ;;  %v272_v37 = vshrl.u32 %v61_v23, 16  ;;  %v1294_v53 = vld [vmem:[%s1944_s0 + $0x10] sm:$0xff]  ;;  %v1666_v54 = vld [vmem:[%s1944_s0 + $0x18] sm:$0xff]  ;;  %v1462_v59 = vld [vmem:[%s1943_s1 + $0x88] sm:$0xff]  }
   0xe   :  { %179 = vmatpush1.bf16.msra.mxu0 %v1452_v8  ;;  %371 = vmatpush1.bf16.msra.mxu1 %v1453_v9  ;;  %v256_v40 = vrot.slane %v254_v33, 3  ;;  %v259_v41 = vrot.slane %v257_v34, 4  ;;  %v275_v44 = vshll.u32 %v61_v23, 16  ;;  %v239_v51 = vrot.slane %v237_v43, 3  ;;  %v1463_v60 = vld [vmem:[%s1943_s1 + $0x40] sm:$0xff]   ;;  %v1464_v9 = vld [vmem:[%s1943_s1 + $0x90] sm:$0xff]  }
   0xf   :  { %180 = vmatprep.subr.bf16.mxu0 %v1501_v0  ;;  %372 = vmatprep.subr.bf16.mxu1 %v1501_v0  ;;  %v229_v38 = vshrl.u32 %v56_v29, 16  ;;  %v232_v42 = vshll.u32 %v56_v29, 16  ;;  %v252_v45 = vor.u32 %v251_v36, %v248_v35  ;;  %v242_v52 = vrot.slane %v240_v46, 4  ;;  %v55_v3 = vld [vmem:[#allocation2 + $0x68] sm:$0x7f]  ;;  %v1465_v23 = vld [vmem:[%s1943_s1 + $0x98] sm:$0xff]  }
  0x10   :  { %v260_v48 = vor.u32 %v259_v41, %v256_v40  ;;  %v60_v56 = vpack.c.bf16 %v1666_v54, %v1294_v53  ;;  %v274_v57 = vrot.slane %v272_v37, 3  ;;  %v277_v58 = vrot.slane %v275_v44, 4  ;;  %v54_v5 = vld [vmem:[#allocation2 + $0x60] sm:$0x7f]  ;;  %v83_v27 = vld [vmem:[#allocation2 + $0x68] sm:$0xff]  ;;  %v1468_v44 = vld [vmem:[%s1943_s1 + $0xb0] sm:$0xff]  }
  0x11   :  { %v231_v49 = vrot.slane %v229_v38, 3  ;;  %v234_v50 = vrot.slane %v232_v42, 4  ;;  %v243_v62 = vor.u32 %v242_v52, %v239_v51  ;;  %v63_v4 = vpack.c.bf16 %v55_v3, %v55_v3  ;;  %v1467_v40 = vld [vmem:[%s1943_s1 + $0xa8] sm:$0xff]  }
  0x12   :  { %181 = vmatpush1.bf16.msra.mxu0 %v1454_v10  ;;  %373 = vmatpush1.bf16.msra.mxu1 %v1455_v11  ;;  %v261_v55 = vsel %vm227_vm1, %v252_v45, %v260_v48  ;;  %v263_v63 = vshrl.u32 %v60_v56, 16  ;;  %v266_v1 = vshll.u32 %v60_v56, 16  ;;  %v278_v7 = vor.u32 %v277_v58, %v274_v57  ;;  %v419_v46 = vld [vmem:[#allocation2 + $0x10] sm:$0xfe]  ;;  %v1471_v52 = vld [vmem:[%s1943_s1 + $0xc8] sm:$0xff]  }
  0x13   :  { %182 = vmatprep.subr.bf16.mxu0 %v1501_v0  ;;  %374 = vmatprep.subr.bf16.mxu1 %v1501_v0  ;;  %v235_v61 = vor.u32 %v234_v50, %v231_v49  ;;  %v1684_v8 = vpack.c.bf16 %v1620_v18, %v1618_v17  ;;  %v290_v10 = vshrl.u32 %v63_v4, 16  ;;  %v293_v11 = vshll.u32 %v63_v4, 16  ;;  %v1470_v50 = vld [vmem:[%s1943_s1 + $0xc0] sm:$0xff]   ;;  %v432_v57 = vld [vmem:[#allocation2 + $0x78] sm:$0x1]  ;;  %v1472_v58 = vld [vmem:[%s1943_s1 + $0xd0] sm:$0xff]  }
  0x14   :  { %1335 = vmatprep.mubr.msk.bf16.mxu1 %vm21_vm0, %v261_v55  ;;  %v265_v14 = vrot.slane %v263_v63, 3  ;;  %v268_v15 = vrot.slane %v266_v1, 4  ;;  %v62_v20 = vpack.c.bf16 %v54_v5, %v54_v5  ;;  %v279_v17 = vsel %vm227_vm1, %v260_v48, %v278_v7  ;;  %v1469_v48 = vld [vmem:[%s1943_s1 + $0xb8] sm:$0xff]  }
  0x15   :  { %v292_v18 = vrot.slane %v290_v10, 3  ;;  %v295_v22 = vrot.slane %v293_v11, 4  ;;  %v1702_v29 = vpack.c.bf16 %v1294_v53, %v1502_v2  ;;  %v1710_v33 = vpack.c.bf16 %v83_v27, %v1622_v19  ;;  %v1477_v27 = vld [vmem:[%s1945_s3 + $0x60] sm:$0xff]  }
  0x16   :  { %183 = vmatpush1.bf16.msra.mxu0 %v1456_v12  ;;  %375 = vmatpush1.bf16.msra.mxu1 %v1457_v13  ;;  %v420_v12 = vld [vmem:[#allocation2 + $0x18] sm:$0xfe]  ;;  %v244_v13 = vsel %vm227_vm1, %v235_v61, %v243_v62  ;;  %v269_v24 = vor.u32 %v268_v15, %v265_v14  ;;  %v284_v26 = vshll.u32 %v62_v20, 16  ;;  %v481_v38 = vshll.u32 %v1684_v8, 16 }
  0x17   :  { %184 = vmatprep.subr.bf16.mxu0 %v1501_v0  ;;  %376 = vmatprep.subr.bf16.mxu1 %v1501_v0  ;;  %v434_v21 = vpack.c.bf16 %v1615_v16, %v420_v12  ;;  %v281_v16 = vshrl.u32 %v62_v20, 16  ;;  %v296_v30 = vor.u32 %v295_v22, %v292_v18  ;;  %v88_v43 = vpack.c.bf16 %v1502_v2, %v1666_v54 }
  0x18   :  { %v286_v35 = vrot.slane %v284_v26, 4  ;;  %v483_v42 = vrot.slane %v481_v38, 1  ;;  %v433_v49 = vpack.c.bf16 %v1638_v25, %v419_v46  ;;  %v469_v25 = vshll.u32 %v1702_v29, 16  ;;  %v1476_v26 = vld [vmem:[%s1945_s3] sm:$0xff]   ;;  %v1488_v38 = vld [vmem:[%s1945_s3 + $0x30] sm:$0xff]  }
  0x19   :  { %v476_v28 = vshll.u32 %v434_v21, 16  ;;  %v283_v34 = vrot.slane %v281_v16, 3  ;;  %v474_v36 = vshrl.u32 %v434_v21, 16  ;;  %v493_v55 = vshrl.u32 %v1684_v8, 16  ;;  %v1475_v16 = vld [vmem:[%s1945_s3 + $0x58] sm:$0xff]  }
  0x1a   :  { %185 = vmatpush1.bf16.msra.mxu0 %v1458_v31  ;;  %377 = vmatpush1.bf16.msra.mxu1 %v1459_v32  ;;  %v1466_v31 = vld [vmem:[%s1943_s1 + $0xa0] sm:$0xff]   ;;  %v270_v32 = vsel %vm227_vm1, %v243_v62, %v269_v24  ;;  %v464_v51 = vshll.u32 %v433_v49, 16  ;;  %v462_v53 = vshrl.u32 %v433_v49, 16  ;;  %v497_v56 = vshll.u32 %v1710_v33, 16 }
  0x1b   :  { %186 = vmatprep.subr.bf16.mxu0 %v1501_v0  ;;  %378 = vmatprep.subr.bf16.mxu1 %v1501_v0  ;;  %v478_v37 = vrot.slane %v476_v28, 1  ;;  %v287_v19 = vor.u32 %v286_v35, %v283_v34  ;;  %v495_v61 = vor.u32 %v493_v55, %v483_v42  ;;  %v440_v63 = vpack.c.bf16 %v432_v57, %v432_v57  ;;  %v1478_v28 = vld [vmem:[%s1945_s3 + $0x8] sm:$0xff]   ;;  %v1484_v34 = vld [vmem:[%s1945_s3 + $0x20] sm:$0xff]  }
  0x1c   :  { %v466_v54 = vrot.slane %v464_v51, 1  ;;  %v499_v62 = vrot.slane %v497_v56, 1  ;;  %v485_v3 = vshrl.u32 %v1702_v29, 16  ;;  %v489_v4 = vshll.u32 %v88_v43, 16  ;;  %v1485_v35 = vld [vmem:[%s1945_s3 + $0x80] sm:$0xff]   ;;  %v681_v57 = vld [vmem:[#allocation3 + $0x48] sm:$0xff] }
  0x1d   :  { %v479_v41 = vor.u32 %v478_v37, %v474_v36  ;;  %v288_v45 = vsel %vm227_vm1, %v269_v24, %v287_v19  ;;  %v501_v15 = vshrl.u32 %v88_v43, 16  ;;  %v1474_v24 = vld [vmem:[%s1945_s3 + $0x50] sm:$0xff]   ;;  %v1486_v36 = vld [vmem:[%s1945_s3 + $0x28] sm:$0xff]  }
  0x1e   :  { %187 = vmatpush1.bf16.msra.mxu0 %v1460_v39  ;;  %379 = vmatpush1.bf16.msra.mxu1 %v1461_v47  ;;  %v297_v39 = vsel %vm227_vm1, %v278_v7, %v296_v30  ;;  %v500_v5 = vsel %vm460_vm2, %v495_v61, %v499_v62  ;;  %v513_v7 = vshll.u32 %v440_v63, 16  ;;  %v491_v10 = vrot.slane %v489_v4, 1  ;;  %v1480_v30 = vld [vmem:[%s1945_s3 + $0x10] sm:$0xff]   ;;  %v1487_v37 = vld [vmem:[%s1945_s3 + $0x88] sm:$0xff]  }
  0x1f   :  { %188 = vmatprep.subr.bf16.mxu0 %v1501_v0  ;;  %380 = vmatprep.subr.bf16.mxu1 %v1501_v0  ;;  %v484_v47 = vsel %vm460_vm2, %v479_v41, %v483_v42  ;;  %v677_v19 = vld [vmem:[#allocation3 + $0x28] sm:$0xff]  ;;  %v679_v41 = vld [vmem:[#allocation3 + $0x38] sm:$0xff] }
  0x22   :  { %189 = vmatpush1.bf16.msra.mxu0 %v1462_v59  ;;  %381 = vmatpush1.bf16.msra.mxu1 %v1463_v60  ;;  %v467_v59 = vor.u32 %v466_v54, %v462_v53  ;;  %v471_v60 = vrot.slane %v469_v25, 1 }
  0x23   :  { %583 = vmatprep.subr.bf16.mxu0 %v1501_v0  ;;  %802 = vmatprep.subr.bf16.mxu1 %v1501_v0 }
  0x24   :  { %v472_v1 = vsel %vm460_vm2, %v467_v59, %v471_v60 }
  0x25   :  { %205 = vmatmul.mubr.bf16.vlgmr.msra.gmra.mrb[0].mxu0 %v84_v6  ;;  %397 = vmatmul.mubr.bf16.vlgmr.msra.gmra.mrb[0].mxu1 %v244_v13  ;;  %v509_v6 = vshrl.u32 %v1710_v33, 16  ;;  %v515_v13 = vrot.slane %v513_v7, 1 }
  0x26   :  { %584 = vmatpush1.bf16.msra.mxu0 %v1464_v9  ;;  %1324 = vmatprep.mubr.msk.bf16.mxu0 %vm21_vm0, %v1684_v8  ;;  %v431_v8 = vld [vmem:[#allocation2 + $0x70] sm:$0x1]  ;;  %v487_v9 = vor.u32 %v485_v3, %v471_v60  ;;  %v1838_v60 = vpack.c.bf16 %v681_v57, %v679_v41 }
  0x27   :  { %585 = vmatprep.subr.bf16.mxu0 %v1501_v0  ;;  %1336 = vmatprep.mubr.msk.bf16.mxu1 %vm21_vm0, %v279_v17  ;;  %v439_v11 = vpack.c.bf16 %v431_v8, %v431_v8  ;;  %v511_v12 = vor.u32 %v509_v6, %v499_v62  ;;  %v503_v17 = vor.u32 %v501_v15, %v491_v10 }
  0x28   :  { %v492_v14 = vsel %vm460_vm2, %v487_v9, %v491_v10 }
  0x29   :  { %v505_v20 = vshll.u32 %v439_v11, 16  ;;  %v516_v21 = vsel %vm460_vm2, %v511_v12, %v515_v13 }
  0x2a   :  { %586 = vmatpush1.bf16.msra.mxu0 %v1465_v23  ;;  %v1473_v23 = vld [vmem:[%s1945_s3 + $0x48] sm:$0xff]  }
  0x2b   :  { %587 = vmatprep.subr.bf16.mxu0 %v1501_v0  ;;  %v507_v18 = vrot.slane %v505_v20, 1  ;;  %803 = vmatpush1.bf16.msra.mxu1 %v1473_v23 }
  0x2c   :  { %804 = vmatprep.subr.bf16.mxu1 %v1501_v0 }
  0x2d   :  { %213 = vmatmul.mubr.bf16.gmra.mrb[4].mxu0 %v1702_v29  ;;  %405 = vmatmul.mubr.bf16.gmra.mrb[4].mxu1 %v270_v32  ;;  %v508_v22 = vsel %vm460_vm2, %v503_v17, %v507_v18  ;;  %v1479_v29 = vld [vmem:[%s1945_s3 + $0x68] sm:$0xff]   ;;  %v1482_v32 = vld [vmem:[%s1945_s3 + $0x18] sm:$0xff]  }
  0x2e   :  { %588 = vmatpush1.bf16.msra.mxu0 %v1466_v31  ;;  %1325 = vmatprep.mubr.msk.bf16.mxu0 %vm21_vm0, %v1710_v33  ;;  %v1481_v31 = vld [vmem:[%s1945_s3 + $0x70] sm:$0xff]   ;;  %v1483_v33 = vld [vmem:[%s1945_s3 + $0x78] sm:$0xff]  }
  0x2f   :  { %589 = vmatprep.subr.bf16.mxu0 %v1501_v0  ;;  %1337 = vmatprep.mubr.msk.bf16.mxu1 %vm21_vm0, %v297_v39  ;;  %v673_v39 = vld [vmem:[#allocation3 + $0x8] sm:$0x80] }
  0x30   :  { %805 = vmatpush1.bf16.msra.mxu1 %v1474_v24 }
  0x31   :  { %806 = vmatprep.subr.bf16.mxu1 %v1501_v0 }
  0x32   :  { %590 = vmatpush1.bf16.msra.mxu0 %v1467_v40  ;;  %v675_v40 = vld [vmem:[#allocation3 + $0x18] sm:$0xff] }
  0x33   :  { %591 = vmatprep.subr.bf16.mxu0 %v1501_v0  ;;  %v687_v42 = vpack.c.bf16 %v675_v40, %v673_v39 }
  0x34   :  { %807 = vmatpush1.bf16.msra.mxu1 %v1475_v16 }
  0x35   :  { %220 = vmatmul.mubr.bf16.gmra.mrb[8].mxu0 %v88_v43  ;;  %412 = vmatmul.mubr.bf16.gmra.mrb[8].mxu1 %v288_v45  ;;  %v715_v43 = vpack.c.bf16 %v677_v19, %v675_v40  ;;  %v1489_v45 = vld [vmem:[%s1945_s3 + $0x38] sm:$0xff]   ;;  %v875_v46 = vshrl.u32 %v687_v42, 16 }
  0x36   :  { %592 = vmatpush1.bf16.msra.mxu0 %v1468_v44  ;;  %1365 = vmatprep.mubr.msk.bf16.mxu0 %vm21_vm0, %v484_v47  ;;  %v689_v44 = vpack.c.bf16 %v679_v41, %v677_v19  ;;  %v878_v47 = vshll.u32 %v687_v42, 16 }
  0x37   :  { %593 = vmatprep.subr.bf16.mxu0 %v1501_v0  ;;  %808 = vmatprep.subr.bf16.mxu1 %v1501_v0 }
  0x38   :  { %809 = vmatpush1.bf16.msra.mxu1 %v1477_v27  ;;  %1396 = vmatprep.mubr.msk.bf16.mxu1 %vm21_vm0, %v715_v43  ;;  %v886_v49 = vshll.u32 %v689_v44, 16  ;;  %v880_v51 = vrot.slane %v878_v47, 4 }
  0x39   :  { %810 = vmatprep.subr.bf16.mxu1 %v1501_v0 }
  0x3a   :  { %594 = vmatpush1.bf16.msra.mxu0 %v1469_v48  ;;  %v883_v48 = vshrl.u32 %v689_v44, 16  ;;  %v888_v54 = vrot.slane %v886_v49, 4 }
  0x3b   :  { %595 = vmatprep.subr.bf16.mxu0 %v1501_v0 }
  0x3c   :  { %811 = vmatpush1.bf16.msra.mxu1 %v1479_v29  ;;  %v885_v53 = vrot.slane %v883_v48, 3 }
  0x3d   :  { %812 = vmatprep.subr.bf16.mxu1 %v1501_v0 }
  0x3e   :  { %596 = vmatpush1.bf16.msra.mxu0 %v1470_v50  ;;  %v877_v50 = vrot.slane %v875_v46, 3  ;;  %v1833_v55 = vor.u32 %v888_v54, %v885_v53  ;;  %v1490_v53 = vld [vmem:[%s1945_s3 + $0x90] sm:$0xff]  }
  0x3f   :  { %597 = vmatprep.subr.bf16.mxu0 %v1501_v0 }
  0x40   :  { %813 = vmatpush1.bf16.msra.mxu1 %v1481_v31  ;;  %v881_v25 = vor.u32 %v880_v51, %v877_v50 }
  0x41   :  { %814 = vmatprep.subr.bf16.mxu1 %v1501_v0 }
  0x42   :  { %598 = vmatpush1.bf16.msra.mxu0 %v1471_v52  ;;  %v1491_v52 = vld [vmem:[%s1945_s3 + $0x40] sm:$0xff]   ;;  %v890_v56 = vsel %vm227_vm1, %v881_v25, %v1833_v55 }
  0x43   :  { %599 = vmatprep.subr.bf16.mxu0 %v1501_v0 }
  0x44   :  { %815 = vmatpush1.bf16.msra.mxu1 %v1483_v33 }
  0x45   :  { %816 = vmatprep.subr.bf16.mxu1 %v1501_v0 }
  0x46   :  { %600 = vmatpush1.bf16.msra.mxu0 %v1472_v58  ;;  %v1049_v58 = vld [vmem:[#allocation3 + $0x18] sm:$0xfe] }
  0x47   :  { %993 = vmatprep.subr.bf16.mxu0 %v1501_v0  ;;  %v1063_v59 = vpack.c.bf16 %v677_v19, %v1049_v58 }
  0x48   :  { %817 = vmatpush1.bf16.msra.mxu1 %v1485_v35 }
  0x49   :  { %616 = vmatmul.mubr.bf16.vlgmr.msra.gmra.mrb[12].mxu0 %v472_v1  ;;  %818 = vmatprep.subr.bf16.mxu1 %v1501_v0  ;;  %v1104_v61 = vshll.u32 %v1063_v59, 16  ;;  %v1102_v62 = vshrl.u32 %v1063_v59, 16  ;;  %v1109_v1 = vshll.u32 %v1838_v60, 16 }
  0x4a   :  { %1366 = vmatprep.mubr.msk.bf16.mxu0 %vm21_vm0, %v500_v5  ;;  %994 = vmatpush1.bf16.msra.mxu0 %v1476_v26 }
  0x4b   :  { %995 = vmatprep.subr.bf16.mxu0 %v1501_v0  ;;  %v1106_v63 = vrot.slane %v1104_v61, 1  ;;  %v1841_v4 = vrot.slane %v1109_v1, 1 }
  0x4c   :  { %819 = vmatpush1.bf16.msra.mxu1 %v1487_v37 }
  0x4d   :  { %1211 = vmatprep.subr.bf16.mxu1 %v1501_v0  ;;  %v1107_v3 = vor.u32 %v1106_v63, %v1102_v62 }
  0x4e   :  { %996 = vmatpush1.bf16.msra.mxu0 %v1478_v28 }
  0x4f   :  { %997 = vmatprep.subr.bf16.mxu0 %v1501_v0  ;;  %v1845_v5 = vsel %vm460_vm2, %v1107_v3, %v1841_v4 }
  0x51   :  { %624 = vmatmul.mubr.bf16.gmra.mrb[16].mxu0 %v492_v14 }
  0x52   :  { %1367 = vmatprep.mubr.msk.bf16.mxu0 %vm21_vm0, %v516_v21  ;;  %998 = vmatpush1.bf16.msra.mxu0 %v1480_v30 }
  0x53   :  { %999 = vmatprep.subr.bf16.mxu0 %v1501_v0 }
  0x56   :  { %1000 = vmatpush1.bf16.msra.mxu0 %v1482_v32 }
  0x57   :  { %1001 = vmatprep.subr.bf16.mxu0 %v1501_v0 }
  0x59   :  { %631 = vmatmul.mubr.bf16.gmra.mrb[20].mxu0 %v508_v22 }
  0x5a   :  { %1002 = vmatpush1.bf16.msra.mxu0 %v1484_v34  ;;  %1408 = vmatprep.mubr.msk.bf16.mxu0 %vm21_vm0, %v890_v56 }
  0x5b   :  { %1003 = vmatprep.subr.bf16.mxu0 %v1501_v0 }
  0x5e   :  { %1004 = vmatpush1.bf16.msra.mxu0 %v1486_v36  ;;  %v683_v36 = vld [vmem:[#allocation3 + $0x58] sm:$0xff] }
  0x5f   :  { %1005 = vmatprep.subr.bf16.mxu0 %v1501_v0  ;;  %v691_v41 = vpack.c.bf16 %v683_v36, %v681_v57 }
  0x61   :  { %v901_v48 = vshrl.u32 %v691_v41, 16  ;;  %v904_v49 = vshll.u32 %v691_v41, 16 }
  0x62   :  { %1006 = vmatpush1.bf16.msra.mxu0 %v1488_v38  ;;  %v1850_v38 = vld [vmem:[%s1946_s2] ss:$0 sm:$0xff] }
  0x63   :  { %1007 = vmatprep.subr.bf16.mxu0 %v1501_v0  ;;  %v903_v61 = vrot.slane %v901_v48, 3  ;;  %v906_v62 = vrot.slane %v904_v49, 4 }
  0x66   :  { %1008 = vmatpush1.bf16.msra.mxu0 %v1489_v45  ;;  %v672_v45 = vld [vmem:[#allocation3] sm:$0x80] }
  0x67   :  { %1009 = vmatprep.subr.bf16.mxu0 %v1501_v0 }
  0x6a   :  { %1010 = vmatpush1.bf16.msra.mxu0 %v1491_v52 }
  0xf8   :  { %v206_v6 = vpop.f32.mrb[0].mxu0  ;;  %v398_v7 = vpop.f32.mrb[0].mxu1 }
  0xf9   :  { %v208_v8 = vpop.f32.mrb[1].mxu0  ;;  %v399_v9 = vadd.f32 %v398_v7, %v206_v6  ;;  %v400_v10 = vpop.f32.mrb[1].mxu1  ;;  %v685_v6 = vld [vmem:[#allocation3 + $0x68] sm:$0x7f]  ;;  %v1492_v7 = vld [vmem:[%s1945_s3 + $0x98] sm:$0xff]  }
  0xfa   :  { %v209_v11 = vpop.f32.mrb[2].mxu0  ;;  %v401_v12 = vpop.f32.mrb[2].mxu1 }
  0xfb   :  { %v211_v13 = vpop.f32.mrb[3].mxu0  ;;  %v402_v14 = vadd.f32 %v401_v12, %v209_v11  ;;  %v403_v15 = vpop.f32.mrb[3].mxu1  ;;  %v713_v12 = vld [vmem:[#allocation3 + $0x68] sm:$0xff] }
  0xfc   :  { %v693_v15 = vpack.c.bf16 %v685_v6, %v685_v6 }
 0x100   :  { %v214_v20 = vpop.f32.mrb[4].mxu0  ;;  %v406_v17 = vpop.f32.mrb[4].mxu1 }
 0x101   :  { %v215_v21 = vpop.f32.mrb[5].mxu0  ;;  %v407_v22 = vpop.f32.mrb[5].mxu1 }
 0x102   :  { %v216_v18 = vpop.f32.mrb[6].mxu0  ;;  %v408_v24 = vpop.f32.mrb[6].mxu1 }
 0x103   :  { %v218_v23 = vpop.f32.mrb[7].mxu0  ;;  %v409_v16 = vadd.f32 %v408_v24, %v216_v18  ;;  %v410_v26 = vpop.f32.mrb[7].mxu1  ;;  %v1493_v24 = vld [vmem:[%s1945_s3 + $0xa0] sm:$0xff]  }
 0x108   :  { %v221_v27 = vpop.f32.mrb[8].mxu0  ;;  %v413_v29 = vpop.f32.mrb[8].mxu1 }
 0x109   :  { %v223_v28 = vpop.f32.mrb[9].mxu0  ;;  %v414_v31 = vadd.f32 %v413_v29, %v221_v27  ;;  %v415_v32 = vpop.f32.mrb[9].mxu1 }
 0x10a   :  { %v224_v30 = vpop.f32.mrb[10].mxu0  ;;  %v416_v34 = vpop.f32.mrb[10].mxu1  ;;  %v1500_v28 = vld [vmem:[#allocation2] sm:$0xff] }
 0x10b   :  { %v225_v33 = vpop.f32.mrb[11].mxu0  ;;  %v417_v35 = vpop.f32.mrb[11].mxu1 }
 0x10c   :  { %v919_v35 = vshrl.u32 %v693_v15, 16 }
 0x11c   :  { %v617_v37 = vpop.f32.mrb[12].mxu0 }
 0x11d   :  { %v638_v39 = vadd.f32 %v617_v37, %v399_v9  ;;  %v619_v40 = vpop.f32.mrb[13].mxu0  ;;  %v922_v37 = vshll.u32 %v693_v15, 16  ;;  %v1499_v15 = vld [vmem:[%s1945_s3 + $0xd0] sm:$0xff]  }
 0x11e   :  { %v620_v19 = vpop.f32.mrb[14].mxu0 }
 0x11f   :  { %v658_v42 = vadd.f32 %v1850_v38, %v638_v39  ;;  %v639_v43 = vadd.f32 %v620_v19, %v402_v14  ;;  %v622_v44 = vpop.f32.mrb[15].mxu0  ;;  %v1865_v14 = vor.u32 %v906_v62, %v903_v61 }
 0x120   :  { %v921_v44 = vrot.slane %v919_v35, 3 }
 0x121   :  { %v660_v46 = vmax.f32 %v658_v42, 0.0  ;;  %v659_v47 = vadd.f32 %v1850_v38, %v639_v43  ;;  %v908_v34 = vsel %vm227_vm1, %v1833_v55, %v1865_v14  ;;  %v1494_v42 = vld [vmem:[%s1945_s3 + $0xa8] sm:$0xff]  }
 0x123   :  { %662 = vst [vmem:[#allocation3 + $0x10] sm:$0xff] %v660_v46  ;;  %v661_v50 = vmax.f32 %v659_v47, 0.0  ;;  %v686_v51 = vpack.c.bf16 %v660_v46, %v672_v45  ;;  %v924_v45 = vrot.slane %v922_v37, 4 }
 0x124   :  { %v625_v52 = vpop.f32.mrb[16].mxu0 }
 0x125   :  { %v626_v54 = vpop.f32.mrb[17].mxu0  ;;  %v688_v25 = vpack.c.bf16 %v1502_v2, %v661_v50  ;;  %v714_v56 = vpack.c.bf16 %v661_v50, %v660_v46  ;;  %v858_v57 = vshrl.u32 %v686_v51, 16  ;;  %v861_v58 = vshll.u32 %v686_v51, 16 }
 0x126   :  { %v627_v59 = vpop.f32.mrb[18].mxu0 }
 0x127   :  { %v640_v63 = vadd.f32 %v627_v59, %v409_v16  ;;  %v629_v1 = vpop.f32.mrb[19].mxu0  ;;  %835 = vmatmul.mubr.bf16.vlgmr.msra.gmra.mrb[12].mxu1 %v714_v56  ;;  %v866_v3 = vshrl.u32 %v688_v25, 16  ;;  %v860_v2 = vrot.slane %v858_v57, 3  ;;  %v863_v8 = vrot.slane %v861_v58, 4 }
 0x128   :  { %1212 = vmatpush1.bf16.msra.mxu1 %v1490_v53  ;;  %1397 = vmatprep.mubr.msk.bf16.mxu1 %vm21_vm0, %v1838_v60  ;;  %v869_v9 = vshll.u32 %v688_v25, 16  ;;  %v1870_v16 = vpack.c.bf16 %v713_v12, %v683_v36  ;;  %v684_v36 = vld [vmem:[#allocation3 + $0x60] sm:$0x7f]  ;;  %v925_v25 = vor.u32 %v924_v45, %v921_v44 }
 0x129   :  { %v665_v10 = vadd.f32 %v1850_v38, %v640_v63  ;;  %1213 = vmatprep.subr.bf16.mxu1 %v1501_v0  ;;  %v868_v11 = vrot.slane %v866_v3, 3  ;;  %v864_v22 = vor.u32 %v863_v8, %v860_v2  ;;  %v692_v46 = vpack.c.bf16 %v684_v36, %v684_v36  ;;  %v1496_v63 = vld [vmem:[%s1945_s3 + $0xb8] sm:$0xff]  }
 0x12a   :  { %v871_v13 = vrot.slane %v869_v9, 4  ;;  %v1048_v20 = vld [vmem:[#allocation3 + $0x10] sm:$0xfe]  ;;  %v926_v6 = vsel %vm227_vm1, %v1865_v14, %v925_v25  ;;  %v1497_v9 = vld [vmem:[%s1945_s3 + $0xc0] sm:$0xff]   ;;  %v1125_v12 = vshll.u32 %v1870_v16, 16 }
 0x12b   :  { %v667_v21 = vmax.f32 %v665_v10, 0.0  ;;  %v1062_v17 = vpack.c.bf16 %v661_v50, %v1048_v20  ;;  %v1495_v50 = vld [vmem:[%s1945_s3 + $0xb0] sm:$0xff]   ;;  %v910_v56 = vshrl.u32 %v692_v46, 16  ;;  %v913_v57 = vshll.u32 %v692_v46, 16  ;;  %v1498_v10 = vld [vmem:[%s1945_s3 + $0xc8] sm:$0xff]  }
 0x12c   :  { %v632_v18 = vpop.f32.mrb[20].mxu0  ;;  %1214 = vmatpush1.bf16.msra.mxu1 %v1492_v7  ;;  %v872_v23 = vor.u32 %v871_v13, %v868_v11  ;;  %v1121_v11 = vshrl.u32 %v1838_v60, 16  ;;  %v1061_v13 = vld [vmem:[#allocation3 + $0x78] sm:$0x1] }
 0x12d   :  { %v641_v26 = vadd.f32 %v632_v18, %v414_v31  ;;  %1215 = vmatprep.subr.bf16.mxu1 %v1501_v0  ;;  %v634_v27 = vpop.f32.mrb[21].mxu0  ;;  %v716_v29 = vpack.c.bf16 %v667_v21, %v1500_v28  ;;  %v1092_v30 = vshll.u32 %v1062_v17, 16  ;;  %v1090_v40 = vshrl.u32 %v1062_v17, 16 }
 0x12e   :  { %v873_v32 = vsel %vm227_vm1, %v864_v22, %v872_v23  ;;  %v635_v33 = vpop.f32.mrb[22].mxu0  ;;  %v912_v2 = vrot.slane %v910_v56, 3  ;;  %v915_v8 = vrot.slane %v913_v57, 4  ;;  %v1123_v20 = vor.u32 %v1121_v11, %v1841_v4 }
 0x12f   :  { %v666_v39 = vadd.f32 %v1850_v38, %v641_v26  ;;  %1026 = vmatmul.mubr.bf16.vlgmr.msra.gmra.mrb[24].mxu0 %v873_v32  ;;  %843 = vmatmul.mubr.bf16.gmra.mrb[16].mxu1 %v716_v29  ;;  %v636_v31 = vpop.f32.mrb[23].mxu0  ;;  %v1094_v19 = vrot.slane %v1092_v30, 1  ;;  %v1097_v41 = vshll.u32 %v716_v29, 16  ;;  %v1113_v53 = vshrl.u32 %v716_v29, 16 }
 0x130   :  { %1216 = vmatpush1.bf16.msra.mxu1 %v1493_v24  ;;  %1398 = vmatprep.mubr.msk.bf16.mxu1 %vm21_vm0, %v1870_v16  ;;  %v1069_v17 = vpack.c.bf16 %v1061_v13, %v1061_v13  ;;  %v1137_v18 = vshrl.u32 %v1870_v16, 16 }
 0x131   :  { %v668_v55 = vmax.f32 %v666_v39, 0.0  ;;  %1217 = vmatprep.subr.bf16.mxu1 %v1501_v0  ;;  %1409 = vmatprep.mubr.msk.bf16.mxu0 %vm21_vm0, %v908_v34  ;;  %v1095_v38 = vor.u32 %v1094_v19, %v1090_v40  ;;  %v1099_v43 = vrot.slane %v1097_v41, 1 }
 0x132   :  { %v1141_v22 = vshll.u32 %v1069_v17, 16 }
 0x133   :  { %v690_v47 = vpack.c.bf16 %v668_v55, %v667_v21  ;;  %v1885_v48 = vpack.c.bf16 %v1500_v28, %v668_v55  ;;  %v1100_v49 = vsel %vm460_vm2, %v1095_v38, %v1099_v43  ;;  %v1115_v61 = vor.u32 %v1113_v53, %v1099_v43 }
 0x134   :  { %1218 = vmatpush1.bf16.msra.mxu1 %v1494_v42  ;;  %v1127_v21 = vrot.slane %v1125_v12, 1  ;;  %v1143_v26 = vrot.slane %v1141_v22, 1 }
 0x135   :  { %1219 = vmatprep.subr.bf16.mxu1 %v1501_v0  ;;  %v892_v51 = vshrl.u32 %v690_v47, 16  ;;  %v895_v52 = vshll.u32 %v690_v47, 16  ;;  %v1117_v54 = vshll.u32 %v1885_v48, 16  ;;  %v1129_v4 = vshrl.u32 %v1885_v48, 16 }
 0x136   :  { %v1128_v60 = vsel %vm460_vm2, %v1123_v20, %v1127_v21  ;;  %v1139_v24 = vor.u32 %v1137_v18, %v1127_v21 }
 0x137   :  { %850 = vmatmul.mubr.bf16.gmra.mrb[20].mxu1 %v1885_v48  ;;  %v894_v58 = vrot.slane %v892_v51, 3  ;;  %v897_v59 = vrot.slane %v895_v52, 4  ;;  %v1119_v62 = vrot.slane %v1117_v54, 1 }
 0x138   :  { %1220 = vmatpush1.bf16.msra.mxu1 %v1495_v50  ;;  %1438 = vmatprep.mubr.msk.bf16.mxu1 %vm21_vm0, %v1845_v5  ;;  %v916_v5 = vor.u32 %v915_v8, %v912_v2  ;;  %v1144_v28 = vsel %vm460_vm2, %v1139_v24, %v1143_v26 }
 0x139   :  { %1221 = vmatprep.subr.bf16.mxu1 %v1501_v0  ;;  %v898_v1 = vor.u32 %v897_v59, %v894_v58  ;;  %v1120_v3 = vsel %vm460_vm2, %v1115_v61, %v1119_v62  ;;  %v1131_v29 = vor.u32 %v1129_v4, %v1119_v62  ;;  %v1441_v58 = vld [vmem:[%s1947_s4] ss:$0 sm:$0xff] }
 0x13b   :  { %v899_v7 = vsel %vm227_vm1, %v872_v23, %v898_v1  ;;  %v917_v14 = vsel %vm227_vm1, %v898_v1, %v916_v5  ;;  %v1060_v23 = vld [vmem:[#allocation3 + $0x70] sm:$0x1] }
 0x13c   :  { %1222 = vmatpush1.bf16.msra.mxu1 %v1496_v63  ;;  %1034 = vmatmul.mubr.bf16.gmra.mrb[28].mxu0 %v899_v7  ;;  %v1068_v27 = vpack.c.bf16 %v1060_v23, %v1060_v23 }
 0x13d   :  { %1223 = vmatprep.subr.bf16.mxu1 %v1501_v0  ;;  %1410 = vmatprep.mubr.msk.bf16.mxu0 %vm21_vm0, %v926_v6 }
 0x140   :  { %1224 = vmatpush1.bf16.msra.mxu1 %v1497_v9 }
 0x141   :  { %1225 = vmatprep.subr.bf16.mxu1 %v1501_v0 }
 0x144   :  { %1226 = vmatpush1.bf16.msra.mxu1 %v1498_v10  ;;  %1041 = vmatmul.mubr.bf16.gmra.mrb[32].mxu0 %v917_v14 }
 0x145   :  { %1227 = vmatprep.subr.bf16.mxu1 %v1501_v0  ;;  %v1133_v0 = vshll.u32 %v1068_v27, 16 }
 0x147   :  { %v1135_v30 = vrot.slane %v1133_v0, 1 }
 0x148   :  { %1228 = vmatpush1.bf16.msra.mxu1 %v1499_v15 }
 0x149   :  { %v1136_v16 = vsel %vm460_vm2, %v1131_v29, %v1135_v30 }
 0x14b   :  { %1244 = vmatmul.mubr.bf16.vlgmr.msra.gmra.mrb[24].mxu1 %v1100_v49 }
 0x14c   :  { %1439 = vmatprep.mubr.msk.bf16.mxu1 %vm21_vm0, %v1128_v60 }
 0x153   :  { %1252 = vmatmul.mubr.bf16.gmra.mrb[28].mxu1 %v1120_v3 }
 0x154   :  { %1440 = vmatprep.mubr.msk.bf16.mxu1 %vm21_vm0, %v1144_v28 }
 0x15b   :  { %1259 = vmatmul.mubr.bf16.gmra.mrb[32].mxu1 %v1136_v16 }
 0x1fa   :  { %v836_v32 = vpop.f32.mrb[12].mxu1 }
 0x1fb   :  { %v838_v33 = vpop.f32.mrb[13].mxu1 }
 0x1fc   :  { %v839_v34 = vpop.f32.mrb[14].mxu1 }
 0x1fd   :  { %v841_v35 = vpop.f32.mrb[15].mxu1 }
 0x202   :  { %v1027_v37 = vpop.f32.mrb[24].mxu0  ;;  %v844_v39 = vpop.f32.mrb[16].mxu1 }
 0x203   :  { %v1028_v31 = vadd.f32 %v1027_v37, %v836_v32  ;;  %v1029_v36 = vpop.f32.mrb[25].mxu0  ;;  %v845_v40 = vpop.f32.mrb[17].mxu1 }
 0x204   :  { %v1030_v19 = vpop.f32.mrb[26].mxu0  ;;  %v846_v41 = vpop.f32.mrb[18].mxu1 }
 0x205   :  { %v1031_v42 = vadd.f32 %v1030_v19, %v839_v34  ;;  %v1032_v55 = vpop.f32.mrb[27].mxu0  ;;  %v848_v38 = vpop.f32.mrb[19].mxu1 }
 0x20a   :  { %v851_v43 = vpop.f32.mrb[20].mxu1 }
 0x20b   :  { %v853_v44 = vpop.f32.mrb[21].mxu1 }
 0x20c   :  { %v854_v45 = vpop.f32.mrb[22].mxu1 }
 0x20d   :  { %v855_v46 = vpop.f32.mrb[23].mxu1 }
 0x20f   :  { %v1035_v47 = vpop.f32.mrb[28].mxu0 }
 0x210   :  { %v1036_v48 = vpop.f32.mrb[29].mxu0 }
 0x211   :  { %v1037_v49 = vpop.f32.mrb[30].mxu0 }
 0x212   :  { %v1038_v50 = vadd.f32 %v1037_v49, %v846_v41  ;;  %v1039_v51 = vpop.f32.mrb[31].mxu0 }
 0x217   :  { %v1042_v52 = vpop.f32.mrb[32].mxu0 }
 0x218   :  { %v1043_v53 = vadd.f32 %v1042_v52, %v851_v43  ;;  %v1044_v54 = vpop.f32.mrb[33].mxu0 }
 0x219   :  { %v1045_v25 = vpop.f32.mrb[34].mxu0 }
 0x21a   :  { %v1046_v56 = vpop.f32.mrb[35].mxu0 }
 0x21e   :  { %v1245_v57 = vpop.f32.mrb[24].mxu1 }
 0x21f   :  { %v1266_v59 = vadd.f32 %v1245_v57, %v1028_v31  ;;  %v1247_v61 = vpop.f32.mrb[25].mxu1 }
 0x220   :  { %v1248_v62 = vpop.f32.mrb[26].mxu1 }
 0x221   :  { %v1277_v63 = vadd.f32 %v1441_v58, %v1266_v59  ;;  %v1267_v1 = vadd.f32 %v1248_v62, %v1031_v42  ;;  %v1250_v3 = vpop.f32.mrb[27].mxu1 }
 0x223   :  { %v1279_v6 = vmax.f32 %v1277_v63, 0.0  ;;  %v1278_v7 = vadd.f32 %v1441_v58, %v1267_v1 }
 0x225   :  { %1281 = vst [vmem:[%s1948_s5] sm:$0xff] %v1279_v6  ;;  %v1280_v2 = vmax.f32 %v1278_v7, 0.0 }
 0x226   :  { %v1253_v8 = vpop.f32.mrb[28].mxu1 }
 0x227   :  { %1282 = vst [vmem:[%s1948_s5 + $0x8] sm:$0xff] %v1280_v2  ;;  %v1254_v9 = vpop.f32.mrb[29].mxu1 }
 0x228   :  { %v1255_v5 = vpop.f32.mrb[30].mxu1 }
 0x229   :  { %v1268_v10 = vadd.f32 %v1255_v5, %v1038_v50  ;;  %v1257_v11 = vpop.f32.mrb[31].mxu1 }
 0x22b   :  { %v1283_v12 = vadd.f32 %v1441_v58, %v1268_v10 }
 0x22d   :  { %v1285_v13 = vmax.f32 %v1283_v12, 0.0 }
 0x22e   :  { %v1260_v14 = vpop.f32.mrb[32].mxu1 }
 0x22f   :  { %1442 = vst [vmem:[%s1948_s5 + $0x10] sm:$0xff] %v1285_v13  ;;  %v1269_v15 = vadd.f32 %v1260_v14, %v1043_v53  ;;  %v1262_v20 = vpop.f32.mrb[33].mxu1 }
 0x230   :  { %v1263_v21 = vpop.f32.mrb[34].mxu1 }
 0x231   :  { %v1284_v17 = vadd.f32 %v1441_v58, %v1269_v15  ;;  %v1264_v60 = vpop.f32.mrb[35].mxu1 }
 0x233   :  { %v1286_v18 = vmax.f32 %v1284_v17, 0.0 }
 0x235   :  { %1443 = vst [vmem:[%s1948_s5 + $0x18] sm:$0xff] %v1286_v18 }

</bundles_post_ra>
